<compile_context>
chip_gen: v6e
topology: v6e:2x2x1
jax: 0.10.0
libtpu: 0.0.40
codegen_flags: <defaults>
</compile_context>

<pallas_src>
import functools

import jax
import jax.numpy as jnp
from jax.experimental import pallas as pl
from jax.experimental.pallas import tpu as pltpu

ALPHA = 0.5
TAU = 1.0


def _round_up(x, m):
    return (x + m - 1) // m * m


def _log_softmax(z, valid_mask):
    # z: (B, Cp) f32 (must already be f32 so the -1e30 sentinel is safe).
    # valid_mask: None or (B, Cp) bool (True = real class lane).
    if valid_mask is not None:
        z = jnp.where(valid_mask, z, -1e30)
    m = jnp.max(z, axis=-1, keepdims=True)
    zs = z - m
    lse = jnp.log(jnp.sum(jnp.exp(zs), axis=-1, keepdims=True))
    return zs - lse


def distill_loss_kernel(x_ref, w_ref, b_ref, out_ref, kd_ref, lab_ref,
                        loss_ref, acc_ref, *,
                        alpha, inv_tau, inv_batch, num_classes):
    k = pl.program_id(0)

    # ---- teacher forward (no_grad in torch): K-tiled bf16 matmul, f32 acc ----
    # Bias is folded into the accumulator init so the epilogue has no extra add.
    @pl.when(k == 0)
    def _():
        acc_ref[...] = jnp.broadcast_to(b_ref[...], acc_ref.shape)

    acc_ref[...] += jnp.dot(x_ref[...], w_ref[...],
                            preferred_element_type=jnp.float32)

    # ---- loss epilogue: runs once, on the last reduction step ----
    @pl.when(k == pl.num_programs(0) - 1)
    def _():
        teacher = acc_ref[...]                              # (B, Cp) f32 (+bias)
        c_pad = teacher.shape[-1]
        lane = jax.lax.broadcasted_iota(jnp.int32, teacher.shape, 1)
        valid = (lane < num_classes) if c_pad > num_classes else None

        # base criterion: cross-entropy(outputs, labels), mean over batch
        log_p = _log_softmax(out_ref[...].astype(jnp.float32), valid)
        onehot = lane == lab_ref[...]                       # (B, Cp) bool
        base_loss = -jnp.sum(jnp.where(onehot, log_p, 0.0)) * inv_batch

        # distillation: F.kl_div(log_softmax(kd/T), log_softmax(teacher/T),
        #                        reduction='batchmean', log_target=True)
        # NOTE: the reference module has no tau**2 factor, so none here.
        log_s = _log_softmax(kd_ref[...].astype(jnp.float32) * inv_tau, valid)
        log_t = _log_softmax(teacher * inv_tau, valid)
        kl = jnp.exp(log_t) * (log_t - log_s)
        if valid is not None:
            kl = jnp.where(valid, kl, 0.0)
        distill_loss = jnp.sum(kl) * inv_batch

        loss_ref[0] = (1.0 - alpha) * base_loss + alpha * distill_loss
        loss_ref[1] = base_loss
        loss_ref[2] = distill_loss


def prepare_teacher_params(teacher_w, teacher_b):
    """One-time prep (hoisted out of the per-step path): bf16 cast + pad the
    teacher weights to (round_up(D,128), round_up(C,128)) so no per-call
    weight cast/pad ever touches HBM again."""
    D, num_classes = teacher_w.shape
    c_pad = _round_up(num_classes, 128)
    d_pad = _round_up(D, 128)
    w = teacher_w.astype(jnp.bfloat16)
    if d_pad != D or c_pad != num_classes:
        w = jnp.pad(w, ((0, d_pad - D), (0, c_pad - num_classes)))
    b = teacher_b.astype(jnp.float32)
    if c_pad != num_classes:
        b = jnp.pad(b, ((0, c_pad - num_classes),))
    return w, b.reshape(1, c_pad), num_classes


def _vmem_budget_bytes():
    # Per-generation scoped-VMEM budget: v7x has 64 MiB/core (cap ~40 MiB),
    # v5e/v6e have 128 MiB (cap ~96 MiB).
    try:
        kind = jax.devices()[0].device_kind.lower()
    except Exception:
        kind = ""
    if "v7" in kind or "7x" in kind:
        return 40 << 20
    return 96 << 20


def _plan_k_tiling(B, d_pad, c_pad, out_bytes, kd_bytes, budget):
    """Pick (tk, num_k): single grid step when the whole padded W fits the
    budget; otherwise ~2 MiB W tiles with tk dividing d_pad exactly (no K pad),
    3-deep buffering on the streamed tiles."""
    # Resident / constant-index operands (count the worst-case 2x buffering).
    fixed = 4 * B * c_pad                                 # f32 accumulator
    fixed += 2 * (out_bytes + kd_bytes)                   # student logits
    fixed += 2 * (4 * c_pad + 4 * B * 128)                # bias + labels tiles
    # Single step: whole x and W resident (2x for the default double buffer).
    single = fixed + 2 * 2 * (B * d_pad + d_pad * c_pad)
    if single <= budget:
        return d_pad, 1
    m = d_pad // 128
    bytes_per_128rows = 3 * 2 * (B + c_pad) * 128         # 3-deep bf16 x + W
    rows_budget = max(int((budget - fixed) // bytes_per_128rows), 1)
    rows_target = max((2 << 20) // (2 * c_pad * 128), 1)  # ~2 MiB W tiles
    rows = max(min(rows_budget, rows_target, m), 1)
    num_k = int(pl.cdiv(m, rows))
    while m % num_k:                                       # tk * num_k == d_pad
        num_k += 1
    return (m // num_k) * 128, num_k


def distill_loss(inputs, outputs, outputs_kd, labels, teacher_w_prepared,
                 teacher_b_prepared, *, num_classes, alpha=ALPHA, tau=TAU):
    """Forward of DistillLoss. Returns (loss, [base_loss, distill_loss]).

    teacher_w_prepared / teacher_b_prepared come from prepare_teacher_params
    (bf16, lane/K padded once)."""
    B = inputs.shape[0]
    d_pad, c_pad = teacher_w_prepared.shape
    D = inputs.size // B

    # The only per-call prep on the big operand: flatten + bf16 cast
    # (+ K pad only when D itself is not already 128-aligned).
    x = inputs.reshape(B, -1).astype(jnp.bfloat16)
    if d_pad != D:
        x = jnp.pad(x, ((0, 0), (0, d_pad - D)))
    if outputs.shape[-1] != c_pad:
        pad_c = c_pad - outputs.shape[-1]
        outputs = jnp.pad(outputs, ((0, 0), (0, pad_c)))
        outputs_kd = jnp.pad(outputs_kd, ((0, 0), (0, pad_c)))
    lab2d = labels.reshape(B, 1).astype(jnp.int32)

    budget = _vmem_budget_bytes()
    out_bytes = B * c_pad * outputs.dtype.itemsize
    kd_bytes = B * c_pad * outputs_kd.dtype.itemsize
    tk, num_k = _plan_k_tiling(B, d_pad, c_pad, out_bytes, kd_bytes, budget)

    kernel = functools.partial(
        distill_loss_kernel, alpha=float(alpha), inv_tau=float(1.0 / tau),
        inv_batch=float(1.0 / B), num_classes=num_classes)

    if num_k == 1:
        # Whole W resident in VMEM: one grid step, default specs.
        stream_mode, const_mode = {}, {}
        vmem_est = 2 * 2 * (B * tk + tk * c_pad)
    else:
        # Streamed tiles: 3-deep pipeline keeps the W DMA queue full.
        # Constant-index operands: no double buffering needed.
        stream_mode = dict(pipeline_mode=pl.Buffered(3))
        const_mode = dict(pipeline_mode=pl.Buffered(1))
        vmem_est = 3 * 2 * (B * tk + tk * c_pad)
    vmem_est += (4 * B * c_pad + 2 * (out_bytes + kd_bytes)
                 + 2 * (4 * c_pad + 4 * B * 128))
    vmem_limit = int(min(max(vmem_est + (4 << 20), 16 << 20), budget))

    cost = pl.CostEstimate(
        flops=2 * B * d_pad * c_pad,
        transcendentals=4 * B * c_pad,
        bytes_accessed=(2 * x.size + 2 * teacher_w_prepared.size
                        + out_bytes + kd_bytes + 4 * c_pad + 4 * B),
    )

    out = pl.pallas_call(
        kernel,
        out_shape=jax.ShapeDtypeStruct((3,), jnp.float32),
        grid_spec=pltpu.PrefetchScalarGridSpec(
            num_scalar_prefetch=0,
            grid=(num_k,),
            in_specs=[
                pl.BlockSpec((B, tk), lambda k: (0, k), **stream_mode),      # x
                pl.BlockSpec((tk, c_pad), lambda k: (k, 0), **stream_mode),  # W
                pl.BlockSpec((1, c_pad), lambda k: (0, 0), **const_mode),    # bias
                pl.BlockSpec((B, c_pad), lambda k: (0, 0), **const_mode),    # outputs
                pl.BlockSpec((B, c_pad), lambda k: (0, 0), **const_mode),    # outputs_kd
                pl.BlockSpec((B, 1), lambda k: (0, 0), **const_mode),        # labels
            ],
            out_specs=pl.BlockSpec(memory_space=pltpu.MemorySpace.SMEM),
            scratch_shapes=[pltpu.VMEM((B, c_pad), jnp.float32)],
        ),
        compiler_params=pltpu.CompilerParams(
            dimension_semantics=("arbitrary",),      # K axis is a reduction
            vmem_limit_bytes=vmem_limit),
        cost_estimate=cost,
    )(x, teacher_w_prepared, teacher_b_prepared, outputs, outputs_kd, lab2d)

    # TODO(synk): on v7x (2 TensorCores) split the CLASS axis of W on a leading
    # 'parallel' grid axis (disjoint W HBM traffic per core) and finish the
    # softmax/KL epilogue in a tiny second pass; not worthwhile at these shapes
    # and a no-op on v5e/v6e (1 TC).
    # TODO(synk): the module's running base/distill counters and
    # print-every-100 are host-side mutable state with no kernel equivalent.
    return out[0], [out[1], out[2]]


def distill_loss_reference(inputs, outputs, outputs_kd, labels,
                           teacher_w, teacher_b, alpha=ALPHA, tau=TAU):
    B = inputs.shape[0]
    # Match the kernel's compute dtypes: bf16 operands, f32 accumulation.
    x = inputs.reshape(B, -1).astype(jnp.bfloat16)
    teacher = jnp.dot(x, teacher_w.astype(jnp.bfloat16),
                      preferred_element_type=jnp.float32) + teacher_b[None, :]
    log_p = jax.nn.log_softmax(outputs.astype(jnp.float32), axis=-1)
    base = -jnp.mean(jnp.take_along_axis(log_p, labels[:, None], axis=1))
    log_s = jax.nn.log_softmax(outputs_kd.astype(jnp.float32) / tau, axis=-1)
    log_t = jax.nn.log_softmax(teacher / tau, axis=-1)
    distill = jnp.sum(jnp.exp(log_t) * (log_t - log_s)) / B
    return (1.0 - alpha) * base + alpha * distill, base, distill


if __name__ == "__main__":
    # Small shapes consistent with the forward:
    #   inputs (teacher input, NCHW): (8, 8, 8, 8)  -> flattened D = 512
    #   student outputs / outputs_kd: (8, 128)      -> 128 classes
    #   labels: (8,) int32
    B, C, H, W = 8, 8, 8, 8
    D = C * H * W
    NUM_CLASSES = 128

    key = jax.random.PRNGKey(0)
    k_in, k_out, k_kd, k_lab, k_w = jax.random.split(key, 5)

    inputs = jax.random.normal(k_in, (B, C, H, W), dtype=jnp.float32)
    outputs = jax.random.normal(k_out, (B, NUM_CLASSES), dtype=jnp.float32)
    outputs_kd = jax.random.normal(k_kd, (B, NUM_CLASSES), dtype=jnp.float32)
    labels = jax.random.randint(k_lab, (B,), 0, NUM_CLASSES, dtype=jnp.int32)

    # Deterministic teacher parameters (linear classifier D -> NUM_CLASSES).
    teacher_w = (jax.random.normal(k_w, (D, NUM_CLASSES), dtype=jnp.float32)
                 * (1.0 / jnp.sqrt(D)))
    teacher_b = jnp.zeros((NUM_CLASSES,), dtype=jnp.float32)

    # One-time hoisted prep of the teacher params (bf16 + padding).
    w_prep, b_prep, n_cls = prepare_teacher_params(teacher_w, teacher_b)
    w_prep, b_prep = jax.block_until_ready((w_prep, b_prep))

    loss_fn = jax.jit(functools.partial(
        distill_loss, num_classes=n_cls, alpha=ALPHA, tau=TAU))
    loss, (base_loss, dist_loss) = loss_fn(
        inputs, outputs, outputs_kd, labels, w_prep, b_prep)
    jax.block_until_ready(loss)

    ref_loss, ref_base, ref_dist = distill_loss_reference(
        inputs, outputs, outputs_kd, labels, teacher_w, teacher_b)

    assert jnp.allclose(loss, ref_loss, atol=1e-3, rtol=1e-3), (loss, ref_loss)
    assert jnp.allclose(base_loss, ref_base, atol=1e-3, rtol=1e-3)
    assert jnp.allclose(dist_loss, ref_dist, atol=1e-3, rtol=1e-3)

    print("KERNEL_OK")
</pallas_src>

<mosaic_0001>
module attributes {stable_mosaic.version = 11 : i64} {
  func.func @distill_loss_kernel(%arg0: i32, %arg1: memref<8x512xbf16, #tpu.memory_space<vmem>>, %arg2: memref<512x128xbf16, #tpu.memory_space<vmem>>, %arg3: memref<1x128xf32, #tpu.memory_space<vmem>>, %arg4: memref<8x128xf32, #tpu.memory_space<vmem>>, %arg5: memref<8x128xf32, #tpu.memory_space<vmem>>, %arg6: memref<8x1xi32, #tpu.memory_space<vmem>>, %arg7: memref<3xf32, #tpu.memory_space<smem>>, %arg8: memref<8x128xf32, #tpu.memory_space<vmem>>) attributes {dimension_semantics = [#tpu.dimension_semantics<arbitrary>], iteration_bounds = array<i64: 1>, scalar_prefetch = 0 : i64, scratch_operands = 1 : i64, tpu.core_type = #tpu.core_type<tc>, window_params = [{transform_indices = @transform_0, window_bounds = array<i64: 8, 512>}, {transform_indices = @transform_1, window_bounds = array<i64: 512, 128>}, {pipeline_mode = #tpu.pipeline_mode<synchronous>, transform_indices = @transform_2, window_bounds = array<i64: 1, 128>}, {pipeline_mode = #tpu.pipeline_mode<synchronous>, transform_indices = @transform_3, window_bounds = array<i64: 8, 128>}, {pipeline_mode = #tpu.pipeline_mode<synchronous>, transform_indices = @transform_4, window_bounds = array<i64: 8, 128>}, {pipeline_mode = #tpu.pipeline_mode<synchronous>, transform_indices = @transform_5, window_bounds = array<i64: 8, 1>}, {transform_indices = @transform_6, window_bounds = array<i64: 3>}]} {
    %c0_i32 = arith.constant 0 : i32
    %0 = arith.cmpi eq, %arg0, %c0_i32 : i32
    %1 = arith.extui %0 : i1 to i32
    %c0_i32_0 = arith.constant 0 : i32
    %2 = arith.cmpi ne, %1, %c0_i32_0 : i32
    scf.if %2 {
      %c0_10 = arith.constant 0 : index
      %c0_11 = arith.constant 0 : index
      %12 = vector.load %arg3[%c0_10, %c0_11] : memref<1x128xf32, #tpu.memory_space<vmem>>, vector<1x128xf32>
      %13 = vector.shape_cast %12 : vector<1x128xf32> to vector<1x128xf32>
      %14 = vector.broadcast %13 : vector<1x128xf32> to vector<8x128xf32>
      %c0_12 = arith.constant 0 : index
      %c0_13 = arith.constant 0 : index
      %15 = vector.load %arg8[%c0_12, %c0_13] : memref<8x128xf32, #tpu.memory_space<vmem>>, vector<8x128xf32>
      tpu.vector_store %arg8[%c0_12, %c0_13], %14 {strides = array<i32>} : memref<8x128xf32, #tpu.memory_space<vmem>>, vector<8x128xf32>,
    } else {
    }
    %c0 = arith.constant 0 : index
    %c0_1 = arith.constant 0 : index
    %3 = vector.load %arg8[%c0, %c0_1] : memref<8x128xf32, #tpu.memory_space<vmem>>, vector<8x128xf32>
    %c0_2 = arith.constant 0 : index
    %c0_3 = arith.constant 0 : index
    %4 = vector.load %arg1[%c0_2, %c0_3] : memref<8x512xbf16, #tpu.memory_space<vmem>>, vector<8x512xbf16>
    %c0_4 = arith.constant 0 : index
    %c0_5 = arith.constant 0 : index
    %5 = vector.load %arg2[%c0_4, %c0_5] : memref<512x128xbf16, #tpu.memory_space<vmem>>, vector<512x128xbf16>
    %cst = arith.constant dense<0.000000e+00> : vector<8x128xf32>
    %6 = tpu.matmul %4, %5, %cst {dimension_numbers = #tpu.dot_dimension_numbers<[1], [0], [0], [1], [0, 0, 1, 1], [], []>} : vector<8x512xbf16>, vector<512x128xbf16>, vector<8x128xf32> -> vector<8x128xf32>
    %7 = arith.addf %3, %6 : vector<8x128xf32>
    %c0_6 = arith.constant 0 : index
    %c0_7 = arith.constant 0 : index
    %8 = vector.load %arg8[%c0_6, %c0_7] : memref<8x128xf32, #tpu.memory_space<vmem>>, vector<8x128xf32>
    tpu.vector_store %arg8[%c0_6, %c0_7], %7 {strides = array<i32>} : memref<8x128xf32, #tpu.memory_space<vmem>>, vector<8x128xf32>,
    %c0_i32_8 = arith.constant 0 : i32
    %9 = arith.cmpi eq, %arg0, %c0_i32_8 : i32
    %10 = arith.extui %9 : i1 to i32
    %c0_i32_9 = arith.constant 0 : i32
    %11 = arith.cmpi ne, %10, %c0_i32_9 : i32
    scf.if %11 {
      %c0_10 = arith.constant 0 : index
      %c0_11 = arith.constant 0 : index
      %12 = vector.load %arg8[%c0_10, %c0_11] : memref<8x128xf32, #tpu.memory_space<vmem>>, vector<8x128xf32>
      %13 = tpu.iota {dimensions = array<i32: 1>} : vector<8x128xi32>
      %c0_12 = arith.constant 0 : index
      %c0_13 = arith.constant 0 : index
      %14 = vector.load %arg4[%c0_12, %c0_13] : memref<8x128xf32, #tpu.memory_space<vmem>>, vector<8x128xf32>
      %cst_14 = arith.constant dense<0xFF800000> : vector<8xf32>
      %15 = vector.multi_reduction <maximumf>, %14, %cst_14 [1] : vector<8x128xf32> to vector<8xf32>
      %16 = vector.shape_cast %15 : vector<8xf32> to vector<8x1xf32>
      %17 = vector.broadcast %16 : vector<8x1xf32> to vector<8x128xf32>
      %18 = arith.subf %14, %17 : vector<8x128xf32>
      %19 = math.exp %18 : vector<8x128xf32>
      %cst_15 = arith.constant dense<0.000000e+00> : vector<8xf32>
      %20 = vector.multi_reduction <add>, %19, %cst_15 [1] : vector<8x128xf32> to vector<8xf32>
      %21 = vector.shape_cast %20 : vector<8xf32> to vector<8x1xf32>
      %22 = math.log %21 : vector<8x1xf32>
      %23 = vector.broadcast %22 : vector<8x1xf32> to vector<8x128xf32>
      %24 = arith.subf %18, %23 : vector<8x128xf32>
      %c0_16 = arith.constant 0 : index
      %c0_17 = arith.constant 0 : index
      %25 = vector.load %arg6[%c0_16, %c0_17] : memref<8x1xi32, #tpu.memory_space<vmem>>, vector<8x1xi32>
      %26 = vector.broadcast %25 : vector<8x1xi32> to vector<8x128xi32>
      %27 = arith.cmpi eq, %13, %26 : vector<8x128xi32>
      %cst_18 = arith.constant 0.000000e+00 : f32
      %28 = vector.broadcast %cst_18 : f32 to vector<8x128xf32>
      %29 = arith.select %27, %24, %28 : vector<8x128xi1>, vector<8x128xf32>
      %30 = vector.shape_cast %29 : vector<8x128xf32> to vector<1x8x128xf32>
      %cst_19 = arith.constant dense<0.000000e+00> : vector<1xf32>
      %31 = vector.multi_reduction <add>, %30, %cst_19 [1, 2] : vector<1x8x128xf32> to vector<1xf32>
      %32 = vector.shape_cast %31 : vector<1xf32> to vector<1x1x1xf32>
      %33 = vector.extract %32[0, 0, 0] : f32 from vector<1x1x1xf32>
      %cst_20 = arith.constant 0.000000e+00 : f32
      %34 = arith.subf %cst_20, %33 : f32
      %cst_21 = arith.constant 1.250000e-01 : f32
      %35 = arith.mulf %34, %cst_21 : f32
      %c0_22 = arith.constant 0 : index
      %c0_23 = arith.constant 0 : index
      %36 = vector.load %arg5[%c0_22, %c0_23] : memref<8x128xf32, #tpu.memory_space<vmem>>, vector<8x128xf32>
      %cst_24 = arith.constant 1.000000e+00 : f32
      %37 = vector.broadcast %cst_24 : f32 to vector<8x128xf32>
      %38 = arith.mulf %36, %37 : vector<8x128xf32>
      %cst_25 = arith.constant dense<0xFF800000> : vector<8xf32>
      %39 = vector.multi_reduction <maximumf>, %38, %cst_25 [1] : vector<8x128xf32> to vector<8xf32>
      %40 = vector.shape_cast %39 : vector<8xf32> to vector<8x1xf32>
      %41 = vector.broadcast %40 : vector<8x1xf32> to vector<8x128xf32>
      %42 = arith.subf %38, %41 : vector<8x128xf32>
      %43 = math.exp %42 : vector<8x128xf32>
      %cst_26 = arith.constant dense<0.000000e+00> : vector<8xf32>
      %44 = vector.multi_reduction <add>, %43, %cst_26 [1] : vector<8x128xf32> to vector<8xf32>
      %45 = vector.shape_cast %44 : vector<8xf32> to vector<8x1xf32>
      %46 = math.log %45 : vector<8x1xf32>
      %47 = vector.broadcast %46 : vector<8x1xf32> to vector<8x128xf32>
      %48 = arith.subf %42, %47 : vector<8x128xf32>
      %cst_27 = arith.constant 1.000000e+00 : f32
      %49 = vector.broadcast %cst_27 : f32 to vector<8x128xf32>
      %50 = arith.mulf %12, %49 : vector<8x128xf32>
      %cst_28 = arith.constant dense<0xFF800000> : vector<8xf32>
      %51 = vector.multi_reduction <maximumf>, %50, %cst_28 [1] : vector<8x128xf32> to vector<8xf32>
      %52 = vector.shape_cast %51 : vector<8xf32> to vector<8x1xf32>
      %53 = vector.broadcast %52 : vector<8x1xf32> to vector<8x128xf32>
      %54 = arith.subf %50, %53 : vector<8x128xf32>
      %55 = math.exp %54 : vector<8x128xf32>
      %cst_29 = arith.constant dense<0.000000e+00> : vector<8xf32>
      %56 = vector.multi_reduction <add>, %55, %cst_29 [1] : vector<8x128xf32> to vector<8xf32>
      %57 = vector.shape_cast %56 : vector<8xf32> to vector<8x1xf32>
      %58 = math.log %57 : vector<8x1xf32>
      %59 = vector.broadcast %58 : vector<8x1xf32> to vector<8x128xf32>
      %60 = arith.subf %54, %59 : vector<8x128xf32>
      %61 = math.exp %60 : vector<8x128xf32>
      %62 = arith.subf %60, %48 : vector<8x128xf32>
      %63 = arith.mulf %61, %62 : vector<8x128xf32>
      %64 = vector.shape_cast %63 : vector<8x128xf32> to vector<1x8x128xf32>
      %cst_30 = arith.constant dense<0.000000e+00> : vector<1xf32>
      %65 = vector.multi_reduction <add>, %64, %cst_30 [1, 2] : vector<1x8x128xf32> to vector<1xf32>
      %66 = vector.shape_cast %65 : vector<1xf32> to vector<1x1x1xf32>
      %67 = vector.extract %66[0, 0, 0] : f32 from vector<1x1x1xf32>
      %cst_31 = arith.constant 1.250000e-01 : f32
      %68 = arith.mulf %67, %cst_31 : f32
      %cst_32 = arith.constant 5.000000e-01 : f32
      %69 = arith.mulf %cst_32, %35 : f32
      %cst_33 = arith.constant 5.000000e-01 : f32
      %70 = arith.mulf %cst_33, %68 : f32
      %71 = arith.addf %69, %70 : f32
      %c0_34 = arith.constant 0 : index
      %72 = memref.load %arg7[%c0_34] : memref<3xf32, #tpu.memory_space<smem>>
      memref.store %71, %arg7[%c0_34] : memref<3xf32, #tpu.memory_space<smem>>
      %c1 = arith.constant 1 : index
      %73 = memref.load %arg7[%c1] : memref<3xf32, #tpu.memory_space<smem>>
      memref.store %35, %arg7[%c1] : memref<3xf32, #tpu.memory_space<smem>>
      %c2 = arith.constant 2 : index
      %74 = memref.load %arg7[%c2] : memref<3xf32, #tpu.memory_space<smem>>
      memref.store %68, %arg7[%c2] : memref<3xf32, #tpu.memory_space<smem>>
    } else {
    }
    return
  }
  func.func @transform_0(%arg0: i32) -> (i32, i32) {
    %c0_i32 = arith.constant 0 : i32
    %c0_i32_0 = arith.constant 0 : i32
    return %c0_i32, %arg0 : i32, i32
  }
  func.func @transform_1(%arg0: i32) -> (i32, i32) {
    %c0_i32 = arith.constant 0 : i32
    %c0_i32_0 = arith.constant 0 : i32
    return %arg0, %c0_i32 : i32, i32
  }
  func.func @transform_2(%arg0: i32) -> (i32, i32) {
    %c0_i32 = arith.constant 0 : i32
    %c0_i32_0 = arith.constant 0 : i32
    %c0_i32_1 = arith.constant 0 : i32
    return %c0_i32, %c0_i32_0 : i32, i32
  }
  func.func @transform_3(%arg0: i32) -> (i32, i32) {
    %c0_i32 = arith.constant 0 : i32
    %c0_i32_0 = arith.constant 0 : i32
    %c0_i32_1 = arith.constant 0 : i32
    return %c0_i32, %c0_i32_0 : i32, i32
  }
  func.func @transform_4(%arg0: i32) -> (i32, i32) {
    %c0_i32 = arith.constant 0 : i32
    %c0_i32_0 = arith.constant 0 : i32
    %c0_i32_1 = arith.constant 0 : i32
    return %c0_i32, %c0_i32_0 : i32, i32
  }
  func.func @transform_5(%arg0: i32) -> (i32, i32) {
    %c0_i32 = arith.constant 0 : i32
    %c0_i32_0 = arith.constant 0 : i32
    %c0_i32_1 = arith.constant 0 : i32
    return %c0_i32, %c0_i32_0 : i32, i32
  }
  func.func @transform_6(%arg0: i32) -> i32 {
    %c0_i32 = arith.constant 0 : i32
    %c0_i32_0 = arith.constant 0 : i32
    return %c0_i32 : i32
  }
}

</mosaic_0001>

<bundles_post_ra>
// kernel: distill_loss.1
= control target key start
LH: loop header
LB: loop body
LE: loop exit
PB: predicated region body
PF: predicated region fallthrough
CT: control target
= control target key end

     0   :  { %s791_s0 = inlined_call_operand.vmem [shape: bf16[8,512], index: 0, kind: input, shape index: {}]   ;;  %s792_s1 = inlined_call_operand.vmem [shape: bf16[512,128], index: 1, kind: input, shape index: {}]   ;;  %s793_s2 = inlined_call_operand.vmem [shape: f32[1,128], index: 2, kind: input, shape index: {}]   ;;  %s794_s3 = inlined_call_operand.vmem [shape: f32[8,128], index: 3, kind: input, shape index: {}]   ;;  %s795_s4 = inlined_call_operand.vmem [shape: f32[8,128], index: 4, kind: input, shape index: {}]   ;;  %s796_s5 = inlined_call_operand.vmem [shape: s32[8,1], index: 5, kind: input, shape index: {}]   ;;  %s797_s6 = inlined_call_operand.vmem [shape: f32[3], index: 6, kind: output, shape index: {}]  }
   0x1   :  { %v573_v0 = vld [vmem:[%s792_s1 + $0x78] sm:$0xff]   ;;  %v577_v4 = vld [vmem:[%s792_s1 + $0x70] sm:$0xff]   ;;  %v581_v8 = vld [vmem:[%s792_s1 + $0x68] sm:$0xff]  }
   0x2   :  { %v574_v1 = vld [vmem:[%s792_s1 + $0xf8] sm:$0xff]   ;;  %522 = vmatprep.subr.bf16.mxu0 %v573_v0  ;;  %v578_v5 = vld [vmem:[%s792_s1 + $0xf0] sm:$0xff]   ;;  %v582_v9 = vld [vmem:[%s792_s1 + $0xe8] sm:$0xff]  }
   0x3   :  { %v575_v2 = vld [vmem:[%s792_s1 + $0x38] sm:$0xff]   ;;  %544 = vmatprep.subr.bf16.mxu1 %v574_v1  ;;  %v579_v6 = vld [vmem:[%s792_s1 + $0x30] sm:$0xff]   ;;  %v583_v10 = vld [vmem:[%s792_s1 + $0x28] sm:$0xff]  }
   0x4   :  { %v576_v3 = vld [vmem:[%s792_s1 + $0xb8] sm:$0xff]   ;;  %523 = vmatpush3.bf16.msra.mxu0 %v575_v2  ;;  %v580_v7 = vld [vmem:[%s792_s1 + $0xb0] sm:$0xff]   ;;  %v584_v11 = vld [vmem:[%s792_s1 + $0xa8] sm:$0xff]  }
   0x5   :  { %545 = vmatpush3.bf16.msra.mxu1 %v576_v3  ;;  %524 = vmatprep.subr.bf16.mxu0 %v577_v4  ;;  %v585_v12 = vld [vmem:[%s792_s1 + $0x60] sm:$0xff]   ;;  %v589_v16 = vld [vmem:[%s792_s1 + $0x58] sm:$0xff]   ;;  %v593_v20 = vld [vmem:[%s792_s1 + $0x50] sm:$0xff]  }
   0x6   :  { %546 = vmatprep.subr.bf16.mxu1 %v578_v5  ;;  %v586_v13 = vld [vmem:[%s792_s1 + $0xe0] sm:$0xff]   ;;  %v590_v17 = vld [vmem:[%s792_s1 + $0xd8] sm:$0xff]   ;;  %v594_v21 = vld [vmem:[%s792_s1 + $0xd0] sm:$0xff]  }
   0x7   :  { %v587_v14 = vld [vmem:[%s792_s1 + $0x20] sm:$0xff]   ;;  %v591_v18 = vld [vmem:[%s792_s1 + $0x18] sm:$0xff]   ;;  %v595_v22 = vld [vmem:[%s792_s1 + $0x10] sm:$0xff]  }
   0x8   :  { %525 = vmatpush3.bf16.msra.mxu0 %v579_v6  ;;  %v588_v15 = vld [vmem:[%s792_s1 + $0xa0] sm:$0xff]   ;;  %v592_v19 = vld [vmem:[%s792_s1 + $0x98] sm:$0xff]   ;;  %v596_v23 = vld [vmem:[%s792_s1 + $0x90] sm:$0xff]  }
   0x9   :  { %547 = vmatpush3.bf16.msra.mxu1 %v580_v7  ;;  %526 = vmatprep.subr.bf16.mxu0 %v581_v8  ;;  %v597_v24 = vld [vmem:[%s792_s1 + $0x48] sm:$0xff]   ;;  %v601_v28 = vld [vmem:[%s792_s1 + $0x40] sm:$0xff]  }
   0xa   :  { %548 = vmatprep.subr.bf16.mxu1 %v582_v9  ;;  %v598_v25 = vld [vmem:[%s792_s1 + $0xc8] sm:$0xff]   ;;  %v602_v29 = vld [vmem:[%s792_s1 + $0xc0] sm:$0xff]  }
   0xb   :  { %v599_v26 = vld [vmem:[%s792_s1 + $0x8] sm:$0xff]   ;;  %v603_v30 = vld [vmem:[%s792_s1] sm:$0xff]  }
   0xc   :  { %527 = vmatpush3.bf16.msra.mxu0 %v583_v10  ;;  %v600_v27 = vld [vmem:[%s792_s1 + $0x88] sm:$0xff]   ;;  %v604_v31 = vld [vmem:[%s792_s1 + $0x80] sm:$0xff]  }
   0xd   :  { %549 = vmatpush3.bf16.msra.mxu1 %v584_v11  ;;  %528 = vmatprep.subr.bf16.mxu0 %v585_v12  ;;  %v38_v32 = vld [vmem:[%s791_s0] sm:$0xff]  ;;  %v39_v33 = vld [vmem:[%s791_s0 + $0x8] sm:$0xff] }
   0xe   :  { %550 = vmatprep.subr.bf16.mxu1 %v586_v13 }
  0x10   :  { %529 = vmatpush3.bf16.msra.mxu0 %v587_v14 }
  0x11   :  { %551 = vmatpush3.bf16.msra.mxu1 %v588_v15  ;;  %530 = vmatprep.subr.bf16.mxu0 %v589_v16 }
  0x12   :  { %552 = vmatprep.subr.bf16.mxu1 %v590_v17 }
  0x14   :  { %531 = vmatpush3.bf16.msra.mxu0 %v591_v18 }
  0x15   :  { %553 = vmatpush3.bf16.msra.mxu1 %v592_v19  ;;  %532 = vmatprep.subr.bf16.mxu0 %v593_v20 }
  0x16   :  { %554 = vmatprep.subr.bf16.mxu1 %v594_v21 }
  0x18   :  { %533 = vmatpush3.bf16.msra.mxu0 %v595_v22 }
  0x19   :  { %555 = vmatpush3.bf16.msra.mxu1 %v596_v23  ;;  %534 = vmatprep.subr.bf16.mxu0 %v597_v24 }
  0x1a   :  { %556 = vmatprep.subr.bf16.mxu1 %v598_v25 }
  0x1c   :  { %535 = vmatpush3.bf16.msra.mxu0 %v599_v26 }
  0x1d   :  { %557 = vmatpush3.bf16.msra.mxu1 %v600_v27  ;;  %536 = vmatprep.subr.bf16.mxu0 %v601_v28 }
  0x1e   :  { %558 = vmatprep.subr.bf16.mxu1 %v602_v29 }
  0x20   :  { %537 = vmatpush3.bf16.msra.mxu0 %v603_v30 }
  0x21   :  { %11 = vsyncpa [#allocation4], 0  ;;  %559 = vmatpush3.bf16.msra.mxu1 %v604_v31  ;;  %v486_v34 = vcombine.low %v38_v32, %v38_v32  ;;  %v487_v35 = vcombine.high %v38_v32, %v38_v32  ;;  %v488_v36 = vcombine.low %v39_v33, %v39_v33  ;;  %v489_v37 = vcombine.high %v39_v33, %v39_v33  ;;  %v398_v38 = vld [vmem:[%s794_s3] sm:$0xff]  ;;  %s476_s27 = sshll.u32 %s797_s6, 4  ;;  %s477_s27 = int_to_ptr.vmem [resolvable:$true] %s476_s27 }
  0x22   :  { %399 = vmax.xlane.f32.xlu1 %v398_v38  ;;  %v485_v47 = vld [vmem:[%s793_s2] ss:$0 sm:$0xff]  ;;  %v637_v53 = vmov 0   ;;  %v396_v6 = vlaneseq  ;;  %s623_s30 = scalar_lea.vmem %s477_s27, 16  ;;  %p628_p1 = scmp.lt.s32.totalorder %s477_s27, %s477_s27 }
  0x23   :  { %342 = vmatprep.mubr.bf16.mxu0 %v487_v35  ;;  %382 = vmatprep.mubr.bf16.mxu1 %v489_v37  ;;  %v426_v52 = vld [vmem:[%s795_s4] sm:$0xff]  ;;  %p624_p0 = scmp.ne.s32.totalorder %s477_s27, %s623_s30  ;;  %p629_p2 = scmp.lt.s32.totalorder %s623_s30, %s623_s30 }
  0x24   :  { %343 = vmatmul.mubr.bf16.vlgmr.msra.gmra.mxu0 %v486_v34  ;;  %383 = vmatmul.mubr.bf16.vlgmr.msra.gmra.mxu1 %v488_v36  ;;  %v409_v2 = vld [vmem:[%s796_s5] sm:$0xff]  ;;  %v397_v9 = vand.u32 127, %v396_v6 }
  0x25   :  { %572 = vset.pattern.permute.xlu0 %v637_v53  ;;  %p630_p3 = por %p629_p2, %p628_p1 }
  0x27   :  { %p631_p4 = pnand %p630_p3, %p624_p0 }
  0xab   :  { %v400_v54 = vpop.xlane.xlu1 %399 }
  0xac   :  { %v401_v55 = vsub.f32 %v398_v38, %v400_v54 }
  0xae   :  { %v402_v59 = vmul.f32 1.442695, %v401_v55 }
  0xe4   :  { %v538_v39 = vpop.f32.mrf.mxu0  ;;  %v560_v40 = vpop.f32.mrf.mxu1 }
  0xe6   :  { %v539_v41 = vpop.f32.mrf.mxu0  ;;  %v561_v42 = vpop.f32.mrf.mxu1 }
  0xe7   :  { %v540_v43 = vadd.f32 %v539_v41, %v538_v39  ;;  %v562_v44 = vadd.f32 %v561_v42, %v560_v40 }
  0xe8   :  { %v541_v45 = vpop.f32.mrf.mxu0  ;;  %v563_v46 = vpop.f32.mrf.mxu1 }
  0xe9   :  { %v385_v48 = vadd.f32 %v562_v44, %v540_v43 }
  0xea   :  { %v542_v49 = vpop.f32.mrf.mxu0  ;;  %v564_v50 = vpop.f32.mrf.mxu1 }
  0xeb   :  { %v390_v51 = vadd.f32 %v485_v47, %v385_v48 }
  0xed   :  { %437 = vmax.xlane.f32.xlu0 %v390_v51 }
  0xf1   :  { %427 = vmax.xlane.f32.xlu0 %v426_v52 }
 0x176   :  { %v438_v56 = vpop.xlane.xlu0 %437 }
 0x177   :  { %v439_v57 = vsub.f32 %v390_v51, %v438_v56 }
 0x179   :  { %v440_v58 = vmul.f32 1.442695, %v439_v57 }
 0x17a   :  { %v428_v60 = vpop.xlane.xlu0 %427 }
 0x17b   :  { %609 = vpow2.f32 %v440_v58  ;;  %v429_v61 = vsub.f32 %v426_v52, %v428_v60 }
 0x17c   :  { %611 = vpow2.f32 %v402_v59 }
 0x17d   :  { %v430_v62 = vmul.f32 1.442695, %v429_v61 }
 0x17f   :  { %613 = vpow2.f32 %v430_v62 }
 0x188   :  { %v610_v63 = vpop.eup %609 }
 0x189   :  { %442 = vadd.xlane.f32.xlu1 %v610_v63  ;;  %v612_v0 = vpop.eup %611 }
 0x18c   :  { %v614_v1 = vpop.eup %613 }
 0x18d   :  { %404 = vadd.xlane.f32.xlu1 %v612_v0  ;;  %432 = vadd.xlane.f32.xlu0 %v614_v1 }
 0x1a3   :  { %411 = vperm.xlu0 %572, %v409_v2  }
 0x212   :  { %v443_v3 = vpop.xlane.xlu1 %442 }
 0x213   :  { %615 = vlog2.f32 %v443_v3 }
 0x216   :  { %v405_v4 = vpop.xlane.xlu1 %404  ;;  %v433_v5 = vpop.xlane.xlu0 %432 }
 0x217   :  { %617 = vlog2.f32 %v405_v4 }
 0x218   :  { %619 = vlog2.f32 %v433_v5 }
 0x21e   :  { %v412_v10 = vpop.permute.xlu0 %411 }
 0x21f   :  { %vm413_vm0 = vcmp.eq.s32.totalorder %v397_v9, %v412_v10 }
 0x220   :  { %v616_v7 = vpop.eup %615 }
 0x221   :  { %v445_v8 = vmul.f32 0.6931472, %v616_v7 }
 0x223   :  { %v446_v11 = vsub.f32 %v439_v57, %v445_v8 }
 0x224   :  { %v618_v12 = vpop.eup %617 }
 0x225   :  { %v407_v13 = vmul.f32 0.6931472, %v618_v12  ;;  %v447_v14 = vmul.f32 1.442695, %v446_v11  ;;  %v620_v16 = vpop.eup %619 }
 0x226   :  { %v435_v18 = vmul.f32 0.6931472, %v620_v16 }
 0x227   :  { %v408_v15 = vsub.f32 %v401_v55, %v407_v13  ;;  %621 = vpow2.f32 %v447_v14 }
 0x228   :  { %v436_v19 = vsub.f32 %v429_v61, %v435_v18 }
 0x229   :  { %v414_v17 = vsel %vm413_vm0, %v408_v15, 0.0 }
 0x22a   :  { %415 = vadd.xlane.f32.xlu1 %v414_v17  ;;  %v449_v20 = vsub.f32 %v446_v11, %v436_v19 }
 0x234   :  { %v622_v21 = vpop.eup %621 }
 0x235   :  { %v450_v22 = vmul.f32 %v622_v21, %v449_v20 }
 0x237   :  { %451 = vadd.xlane.f32.xlu1 %v450_v22 }
 0x2b3   :  { %v416_v23 = vpop.xlane.xlu1 %415 }
 0x2b4   :  { %v417_v24 = vrot.slane %v416_v23, 4 }
 0x2b6   :  { %v418_v25 = vadd.f32 %v417_v24, %v416_v23 }
 0x2b8   :  { %v419_v26 = vrot.slane %v418_v25, 2 }
 0x2ba   :  { %v420_v27 = vadd.f32 %v419_v26, %v418_v25 }
 0x2bc   :  { %v421_v28 = vrot.slane %v420_v27, 1 }
 0x2be   :  { %v422_v29 = vadd.f32 %v421_v28, %v420_v27 }
 0x2c0   :  { %566 = vpush %v422_v29  ;;  %v452_v30 = vpop.xlane.xlu1 %451 }
 0x2c1   :  { %v453_v31 = vrot.slane %v452_v30, 4 }
 0x2c3   :  { %v454_v32 = vadd.f32 %v453_v31, %v452_v30 }
 0x2c5   :  { %v455_v33 = vrot.slane %v454_v32, 2 }
 0x2c7   :  { %v456_v34 = vadd.f32 %v455_v33, %v454_v32 }
 0x2c9   :  { %v457_v35 = vrot.slane %v456_v34, 1 }
 0x2cb   :  { %v458_v36 = vadd.f32 %v457_v35, %v456_v34 }
 0x2cd   :  { %568 = vpush %v458_v36 }
 0x2f1   :  { %s567_s5 = spop %566 }
 0x2f2   :  { %s424_s20 = ssub.f32 0.0, %s567_s5 }
 0x2f4   :  { %s425_s21 = smul.f32 0.125, %s424_s20 }
 0x2f6   :  { %467 = sst [smem:[#allocation3 + $0x1]] %s425_s21  ;;  %s461_s24 = smul.f32 0.5, %s425_s21 }
 0x2fe   :  { %s569_s22 = spop %568 }
 0x2ff   :  { %s460_s23 = smul.f32 0.125, %s569_s22 }
 0x301   :  { %s462_s28 = smul.f32 0.5, %s460_s23  ;;  %469 = sst [smem:[#allocation3 + $0x2]] %s460_s23 }
 0x303   :  { %s463_s29 = sadd.f32 %s462_s28, %s461_s24 }
 0x305   :  { %465 = sst [smem:[#allocation3]] %s463_s29 }
 0x306   :  { %634 = shalt.err (!%p631_p4)
}
 0x307   :  { %s638_s7 = smov [#allocation3]  }
 0x308   :  { %479 = dma.smem_to_vmem %s638_s7, 16, %s477_s27, [#allocation4]  }
 0x309   :  { %635 = dma.done.wait [#allocation4], 16  }
 0x30a   :  { %636 = vsyncadd [#allocation4], 4294967280 }
 0x30b   :  { %483 = sfence }
 0x30c   :  { %484 = vsyncpa [#allocation4], 1 }

</bundles_post_ra>
